<compile_context>
chip_gen: v5e
topology: v5e:2x2
jax: 0.10.0
libtpu: 0.0.40
codegen_flags: <defaults>
</compile_context>

<pallas_src>
import functools

import jax
import jax.numpy as jnp
from jax.experimental import pallas as pl
from jax.experimental.pallas import tpu as pltpu

_LANE = 128
_MIB = 1024 * 1024


def _round_up(x, m):
    return ((x + m - 1) // m) * m


def _sublane_pack(itemsize):
    # Rows packed per vreg sublane for the wire dtype: f32->8, bf16->16, int8/fp8->32.
    return {4: 8, 2: 16, 1: 32}.get(int(itemsize), 8)


def _vmem_limit_bytes():
    """Generation-aware scoped-VMEM limit (~64 MiB on v5e/v6e, ~32 MiB on v7x)."""
    cap = 64 * _MIB  # conservative fallback: assume v7x-class 64 MiB physical VMEM
    try:
        info = pltpu.get_tpu_info()
        cap = int(getattr(info, "vmem_capacity_bytes", cap))
    except Exception:
        pass
    return int(min(64 * _MIB, max(16 * _MIB, cap // 2)))


def _choose_tile_n(n, c, itemsize, vmem_limit):
    """Largest batch tile whose VMEM working set fits comfortably under the limit.

    Working set per row (at lane-padded width round_up(C, 128)):
      2x double-buffered wire tile + ~5x f32 temporaries (cast, exp, select, ...).
    """
    sub = _sublane_pack(itemsize)
    lanes = _round_up(max(int(c), 1), _LANE)
    per_row_bytes = 2 * lanes * int(itemsize) + 5 * lanes * 4
    budget = int(0.6 * vmem_limit)                       # headroom for outputs/misc
    tn = max(sub, (budget // per_row_bytes) // sub * sub)
    if tn >= n:
        if n >= 2 * sub:
            # Keep at least two grid steps so the "parallel" axis can shard
            # across both TensorCores on v7x.
            tn = _round_up(pl.cdiv(n, 2), sub)
        else:
            tn = n                                       # single full block
    return tn


def _ce_tile_sum_kernel(logits_ref, targets_ref, partial_ref, *, n_total):
    """Per-tile partial sum of the row-wise negative log-likelihood."""
    i = pl.program_id(0)

    # Wire dtype (e.g. bf16) on the DMA; all softmax math in f32
    # (v5e has no bf16 VPU/EUP path).
    x = logits_ref[...].astype(jnp.float32)                                 # (tn, C)
    t = targets_ref[...]                                                    # (tn, 1)

    # Numerically-stable logsumexp per row.
    m = jnp.max(x, axis=-1, keepdims=True)
    lse = m + jnp.log(jnp.sum(jnp.exp(x - m), axis=-1, keepdims=True))      # (tn, 1)

    # Logit at the target class via iota-compare + masked sum
    # (avoids unsupported dynamic gather on TPU).
    cls_ids = jax.lax.broadcasted_iota(jnp.int32, x.shape, 1)
    sel = jnp.sum(jnp.where(cls_ids == t, x, 0.0), axis=-1, keepdims=True)  # (tn, 1)

    per_row = lse - sel                                                     # NLL per row

    # Mask rows past the true batch size (ragged last tile): OOB garbage
    # (even NaN/Inf) is never selected by the where, so it cannot leak.
    tn = x.shape[0]
    row_ids = i * tn + jax.lax.broadcasted_iota(jnp.int32, per_row.shape, 0)
    per_row = jnp.where(row_ids < n_total, per_row, 0.0)

    # Reduce the whole tile in-kernel: one partial sum per grid step, written
    # into a dense (8, 128) block (unmasked vst, ~4 KiB/tile writeback instead
    # of O(N) lane-sparse per-row stores).
    tile_sum = jnp.sum(per_row, axis=0, keepdims=True)                      # (1, 1)
    r = jax.lax.broadcasted_iota(jnp.int32, partial_ref.shape, 1)
    l = jax.lax.broadcasted_iota(jnp.int32, partial_ref.shape, 2)
    partial_ref[...] = jnp.where((r == 0) & (l == 0), tile_sum, 0.0)


def cross_entropy_loss(inputs, targets, *, tile_n=None):
    """inputs: (N, C) logits (f32 or bf16); targets: (N,) int class indices.

    Returns mean_i [ logsumexp(inputs[i, :]) - inputs[i, targets[i]] ],
    matching torch.nn.functional.cross_entropy with reduction='mean'.
    """
    assert inputs.ndim == 2 and targets.ndim == 1 and targets.shape[0] == inputs.shape[0]
    n, c = inputs.shape
    itemsize = jnp.dtype(inputs.dtype).itemsize
    sub = _sublane_pack(itemsize)
    vmem_limit = _vmem_limit_bytes()

    if tile_n is None:
        tn = _choose_tile_n(n, c, itemsize, vmem_limit)
    else:
        tn = max(1, min(int(tile_n), n))
        if tn < n:
            tn = max(sub, (tn // sub) * sub)   # align to the dtype's sublane packing
    num_tiles = pl.cdiv(n, tn)

    targets_2d = targets.reshape(n, 1).astype(jnp.int32)

    kernel = functools.partial(_ce_tile_sum_kernel, n_total=n)

    partials = pl.pallas_call(
        kernel,
        out_shape=jax.ShapeDtypeStruct((num_tiles, 8, _LANE), jnp.float32),
        grid=(num_tiles,),
        in_specs=[
            pl.BlockSpec((tn, c), lambda i: (i, 0)),   # logits tile, native wire dtype
            pl.BlockSpec((tn, 1), lambda i: (i, 0)),   # targets tile
        ],
        out_specs=pl.BlockSpec((1, 8, _LANE), lambda i: (i, 0, 0)),
        compiler_params=pltpu.CompilerParams(
            dimension_semantics=("parallel",),
            vmem_limit_bytes=vmem_limit,
        ),
    )(inputs, targets_2d)

    # Finalize: only element [t, 0, 0] of each per-tile block is non-zero.
    return jnp.sum(partials) / jnp.float32(n)


if __name__ == "__main__":
    key = jax.random.PRNGKey(0)
    k1, k2, k3, k4, k5, k6 = jax.random.split(key, 6)

    # Module __init__ implies num_class=2; alpha/gamma are unused in forward.
    N, C = 8, 2
    logits = jax.random.normal(k1, (N, C), dtype=jnp.float32)
    targets = jax.random.randint(k2, (N,), 0, C, dtype=jnp.int32)

    loss = jax.block_until_ready(cross_entropy_loss(logits, targets))
    logp = jax.nn.log_softmax(logits, axis=-1)
    ref = -jnp.mean(jnp.take_along_axis(logp, targets[:, None], axis=-1))
    assert jnp.allclose(loss, ref, atol=1e-5, rtol=1e-5), (loss, ref)

    # Tiled + ragged batch (N % tile != 0) with bf16 on the wire.
    N2, C2 = 36, 2
    logits2 = jax.random.normal(k3, (N2, C2), dtype=jnp.float32).astype(jnp.bfloat16)
    targets2 = jax.random.randint(k4, (N2,), 0, C2, dtype=jnp.int32)

    loss2 = jax.block_until_ready(cross_entropy_loss(logits2, targets2, tile_n=16))
    logp2 = jax.nn.log_softmax(logits2.astype(jnp.float32), axis=-1)
    ref2 = -jnp.mean(jnp.take_along_axis(logp2, targets2[:, None], axis=-1))
    assert jnp.allclose(loss2, ref2, atol=1e-4, rtol=1e-4), (loss2, ref2)

    # Auto-tiled path (tile derived from the VMEM budget, >= 2 tiles for v7x).
    N3, C3 = 200, 16
    logits3 = jax.random.normal(k5, (N3, C3), dtype=jnp.float32)
    targets3 = jax.random.randint(k6, (N3,), 0, C3, dtype=jnp.int32)

    loss3 = jax.block_until_ready(cross_entropy_loss(logits3, targets3))
    logp3 = jax.nn.log_softmax(logits3, axis=-1)
    ref3 = -jnp.mean(jnp.take_along_axis(logp3, targets3[:, None], axis=-1))
    assert jnp.allclose(loss3, ref3, atol=2e-5, rtol=2e-5), (loss3, ref3)

    print("KERNEL_OK")
</pallas_src>

<mosaic_0001>
module attributes {stable_mosaic.version = 11 : i64} {
  func.func @_ce_tile_sum_kernel(%arg0: i32, %arg1: memref<8x2xf32, #tpu.memory_space<vmem>>, %arg2: memref<8x1xi32, #tpu.memory_space<vmem>>, %arg3: memref<1x8x128xf32, #tpu.memory_space<vmem>>) attributes {dimension_semantics = [#tpu.dimension_semantics<parallel>], iteration_bounds = array<i64: 1>, scalar_prefetch = 0 : i64, scratch_operands = 0 : i64, tpu.core_type = #tpu.core_type<tc>, window_params = [{transform_indices = @transform_0, window_bounds = array<i64: 8, 2>}, {transform_indices = @transform_1, window_bounds = array<i64: 8, 1>}, {transform_indices = @transform_2, window_bounds = array<i64: 1, 8, 128>}]} {
    %c0 = arith.constant 0 : index
    %c0_0 = arith.constant 0 : index
    %0 = vector.load %arg1[%c0, %c0_0] : memref<8x2xf32, #tpu.memory_space<vmem>>, vector<8x2xf32>
    %c0_1 = arith.constant 0 : index
    %c0_2 = arith.constant 0 : index
    %1 = vector.load %arg2[%c0_1, %c0_2] : memref<8x1xi32, #tpu.memory_space<vmem>>, vector<8x1xi32>
    %cst = arith.constant dense<0xFF800000> : vector<8xf32>
    %2 = vector.multi_reduction <maximumf>, %0, %cst [1] : vector<8x2xf32> to vector<8xf32>
    %3 = vector.shape_cast %2 : vector<8xf32> to vector<8x1xf32>
    %4 = vector.broadcast %3 : vector<8x1xf32> to vector<8x2xf32>
    %5 = arith.subf %0, %4 : vector<8x2xf32>
    %6 = math.exp %5 : vector<8x2xf32>
    %cst_3 = arith.constant dense<0.000000e+00> : vector<8xf32>
    %7 = vector.multi_reduction <add>, %6, %cst_3 [1] : vector<8x2xf32> to vector<8xf32>
    %8 = vector.shape_cast %7 : vector<8xf32> to vector<8x1xf32>
    %9 = math.log %8 : vector<8x1xf32>
    %10 = arith.addf %3, %9 : vector<8x1xf32>
    %11 = tpu.iota {dimensions = array<i32: 1>} : vector<8x2xi32>
    %12 = vector.broadcast %1 : vector<8x1xi32> to vector<8x2xi32>
    %13 = arith.cmpi eq, %11, %12 : vector<8x2xi32>
    %cst_4 = arith.constant 0.000000e+00 : f32
    %14 = vector.broadcast %cst_4 : f32 to vector<8x2xf32>
    %15 = arith.select %13, %0, %14 : vector<8x2xi1>, vector<8x2xf32>
    %cst_5 = arith.constant dense<0.000000e+00> : vector<8xf32>
    %16 = vector.multi_reduction <add>, %15, %cst_5 [1] : vector<8x2xf32> to vector<8xf32>
    %17 = vector.shape_cast %16 : vector<8xf32> to vector<8x1xf32>
    %18 = arith.subf %10, %17 : vector<8x1xf32>
    %c8_i32 = arith.constant 8 : i32
    %19 = arith.muli %arg0, %c8_i32 : i32
    %20 = tpu.iota {dimensions = array<i32: 0>} : vector<8x1xi32>
    %21 = vector.broadcast %19 : i32 to vector<8x1xi32>
    %22 = arith.addi %21, %20 : vector<8x1xi32>
    %c8_i32_6 = arith.constant 8 : i32
    %23 = vector.broadcast %c8_i32_6 : i32 to vector<8x1xi32>
    %24 = arith.cmpi slt, %22, %23 : vector<8x1xi32>
    %cst_7 = arith.constant 0.000000e+00 : f32
    %25 = vector.broadcast %cst_7 : f32 to vector<8x1xf32>
    %26 = arith.select %24, %18, %25 : vector<8x1xi1>, vector<8x1xf32>
    %cst_8 = arith.constant dense<0.000000e+00> : vector<1xf32>
    %27 = vector.multi_reduction <add>, %26, %cst_8 [0] : vector<8x1xf32> to vector<1xf32>
    %28 = vector.shape_cast %27 : vector<1xf32> to vector<1x1xf32>
    %29 = tpu.iota {dimensions = array<i32: 1>} : vector<1x8x128xi32>
    %30 = tpu.iota {dimensions = array<i32: 2>} : vector<1x8x128xi32>
    %c0_i32 = arith.constant 0 : i32
    %31 = vector.broadcast %c0_i32 : i32 to vector<1x8x128xi32>
    %32 = arith.cmpi eq, %29, %31 : vector<1x8x128xi32>
    %c0_i32_9 = arith.constant 0 : i32
    %33 = vector.broadcast %c0_i32_9 : i32 to vector<1x8x128xi32>
    %34 = arith.cmpi eq, %30, %33 : vector<1x8x128xi32>
    %35 = arith.andi %32, %34 : vector<1x8x128xi1>
    %cst_10 = arith.constant 0.000000e+00 : f32
    %36 = vector.shape_cast %28 : vector<1x1xf32> to vector<1x1x1xf32>
    %37 = vector.broadcast %36 : vector<1x1x1xf32> to vector<1x8x128xf32>
    %38 = vector.broadcast %cst_10 : f32 to vector<1x8x128xf32>
    %39 = arith.select %35, %37, %38 : vector<1x8x128xi1>, vector<1x8x128xf32>
    %c0_11 = arith.constant 0 : index
    %c0_12 = arith.constant 0 : index
    %c0_13 = arith.constant 0 : index
    %40 = vector.load %arg3[%c0_11, %c0_12, %c0_13] : memref<1x8x128xf32, #tpu.memory_space<vmem>>, vector<1x8x128xf32>
    tpu.vector_store %arg3[%c0_11, %c0_12, %c0_13], %39 {strides = array<i32>} : memref<1x8x128xf32, #tpu.memory_space<vmem>>, vector<1x8x128xf32>,
    return
  }
  func.func @transform_0(%arg0: i32) -> (i32, i32) {
    %c0_i32 = arith.constant 0 : i32
    %c0_i32_0 = arith.constant 0 : i32
    return %arg0, %c0_i32 : i32, i32
  }
  func.func @transform_1(%arg0: i32) -> (i32, i32) {
    %c0_i32 = arith.constant 0 : i32
    %c0_i32_0 = arith.constant 0 : i32
    return %arg0, %c0_i32 : i32, i32
  }
  func.func @transform_2(%arg0: i32) -> (i32, i32, i32) {
    %c0_i32 = arith.constant 0 : i32
    %c0_i32_0 = arith.constant 0 : i32
    %c0_i32_1 = arith.constant 0 : i32
    return %arg0, %c0_i32, %c0_i32_0 : i32, i32, i32
  }
}

</mosaic_0001>

<bundles_post_ra>
// kernel: tpu_custom_call.1
= control target key start
LH: loop header
LB: loop body
LE: loop exit
PB: predicated region body
PF: predicated region fallthrough
CT: control target
= control target key end

     0   :  { %vm14_vm0 = vcmask 15360   ;;  %s134_s0 = inlined_call_operand.vmem [shape: f32[8,2], index: 0, kind: input, shape index: {}]   ;;  %s135_s1 = inlined_call_operand.vmem [shape: s32[8,1], index: 1, kind: input, shape index: {}]   ;;  %s136_s2 = inlined_call_operand.hbm [shape: f32[1,8,128], index: 2, kind: output, shape index: {}]  }
   0x1   :  { %v12_v0 = vld [vmem:[%s134_s0] sm:$0xff] }
   0x2   :  { %7 = vsyncpa [#allocation3], 0  ;;  %v15_v1 = vsel %vm14_vm0, %v12_v0, -inf  ;;  %v105_v2 = vmov 0   ;;  %v13_v3 = vld [vmem:[%s135_s1] sm:$0xff]  ;;  %v27_v9 = vlaneseq  ;;  %s106_s0 = smov [#allocation2]  }
   0x3   :  { %74 = vset.pattern.permute.xlu0 %v105_v2  ;;  %s61_s1 = sshll.u32 %s106_s0, 4  ;;  %s63_s15 = sshll.u32 %s136_s2, 4  ;;  %s62_s1 = int_to_ptr.vmem [resolvable:$true] %s61_s1  ;;  %s64_s15 = int_to_ptr.hbm [resolvable:$true] %s63_s15 }
   0x4   :  { %16 = vmax.xlane.f32.xlu0 %v15_v1  ;;  %v28_v10 = vand.u32 127, %v27_v9  ;;  %v40_v22 = vshrl.u32 %v27_v9, 7 }
   0x6   :  { %vm52_vm2 = vcmp.eq.s32.totalorder %v28_v10, 0  ;;  %vm51_vm3 = vcmp.eq.s32.totalorder %v40_v22, 0 }
   0x7   :  { %vm53_vm4 = vmand %vm51_vm3, %vm52_vm2 }
  0x18   :  { %30 = vperm.xlu0 %74, %v13_v3  }
  0x77   :  { %v17_v4 = vpop.xlane.xlu0 %16 }
  0x78   :  { %v18_v5 = vsub.f32 %v12_v0, %v17_v4 }
  0x7a   :  { %v19_v6 = vmul.f32 1.442695, %v18_v5 }
  0x7c   :  { %75 = vpow2.f32 %v19_v6 }
  0x82   :  { %v76_v7 = vpop.eup %75 }
  0x83   :  { %v21_v8 = vsel %vm14_vm0, %v76_v7, 0.0 }
  0x84   :  { %22 = vadd.xlane.f32.xlu1 %v21_v8 }
  0x8a   :  { %v31_v11 = vpop.permute.xlu0 %30 }
  0x8b   :  { %vm32_vm1 = vcmp.eq.s32.totalorder %v28_v10, %v31_v11 }
  0x8c   :  { %v33_v12 = vsel %vm32_vm1, %v12_v0, 0.0 }
  0x8d   :  { %v34_v13 = vsel %vm14_vm0, %v33_v12, 0.0 }
  0x8e   :  { %35 = vadd.xlane.f32.xlu1 %v34_v13 }
  0xf7   :  { %v23_v14 = vpop.xlane.xlu1 %22 }
  0xf8   :  { %77 = vlog2.f32 %v23_v14 }
  0xfe   :  { %v78_v15 = vpop.eup %77 }
  0xff   :  { %v25_v16 = vmul.f32 0.6931472, %v78_v15 }
 0x101   :  { %v26_v17 = vadd.f32 %v25_v16, %v17_v4  ;;  %v36_v18 = vpop.xlane.xlu1 %35 }
 0x103   :  { %v37_v19 = vsub.f32 %v26_v17, %v36_v18 }
 0x105   :  { %v45_v20 = vrot.slane %v37_v19, 4 }
 0x107   :  { %v46_v21 = vadd.f32 %v45_v20, %v37_v19 }
 0x109   :  { %v47_v23 = vrot.slane %v46_v21, 2 }
 0x10b   :  { %v48_v24 = vadd.f32 %v47_v23, %v46_v21 }
 0x10d   :  { %v49_v25 = vrot.slane %v48_v24, 1 }
 0x10f   :  { %v50_v26 = vadd.f32 %v49_v25, %v48_v24 }
 0x111   :  { %v54_v27 = vsel %vm53_vm4, %v50_v26, 0.0 }
 0x112   :  { %55 = vst [vmem:[#allocation2] sm:$0xff] %v54_v27 }
 0x113   :  { %66 = dma.vmem_to_hbm [thread:$0]  %s62_s1, 128, %s64_s15, [#allocation3]  }
 0x114   :  { %103 = dma.done.wait [#allocation3], 128  }
 0x115   :  { %104 = vsyncadd [#allocation3], 4294967168 }
 0x116   :  { %71 = vsyncpa [#allocation3], 1 }

</bundles_post_ra>
